<compile_context>
chip_gen: v7x
topology: tpu7x:2x2x1
jax: 0.10.0
libtpu: 0.0.40
codegen_flags: <defaults>
</compile_context>

<pallas_src>
from typing import NamedTuple

import jax
import jax.numpy as jnp
from jax.experimental import pallas as pl
from jax.experimental.pallas import tpu as pltpu


def _round_up(x, m):
    return (x + m - 1) // m * m


def _noisy_linear_kernel(x_ref, mu_ref, sigma_ref, eps_ref, o_ref, w_scratch):
    m = pl.program_id(1)  # batch block (inner grid axis)

    # Build the noisy weight block once per out-feature block and reuse it across all
    # batch tiles.  mu/sigma/eps block indices are constant along the batch axis, so
    # they are not re-streamed for m > 0.  Carried dependence -> batch axis must stay
    # "arbitrary" in dimension_semantics.
    @pl.when(m == 0)
    def _build_noisy_weight():
        w_scratch[...] = mu_ref[...] + sigma_ref[...] * eps_ref[...]

    # Weight is already (in, out): contraction on the RHS sublane axis, no per-tile
    # transpose.  f32 accumulation on the MXU.
    o_ref[...] = jnp.dot(
        x_ref[...], w_scratch[...], preferred_element_type=jnp.float32
    ).astype(o_ref.dtype)


class NoisyLinearParams(NamedTuple):
    mu_t: jax.Array        # (in_features, out_pad) f32, pre-transposed, lane-padded
    sigma_t: jax.Array     # (in_features, out_pad) f32, zero-padded columns
    out_features: int
    tn: int                # out-feature tile (multiple of 128, divides out_pad)


def _vmem_estimate(tm, tn, k):
    # x (2 bufs) + mu/sigma/eps (2 bufs each) + weight scratch + out (2 bufs), f32.
    return 4 * (2 * tm * k + 3 * 2 * k * tn + k * tn + 2 * tm * tn)


def prepare_noisy_linear_params(weight_mu, weight_sigma, *, block_n=512, block_m=256):
    """One-time layout plumbing: (out, in) torch layout -> (in, out_pad), lane-dense.

    Do this at module init / parameter update, NOT per forward call, so each forward
    reads mu/sigma straight from HBM without extra transpose traffic.
    """
    out_features, in_features = weight_mu.shape

    n128 = _round_up(out_features, 128)
    tn = min(_round_up(block_n, 128), n128)
    # v7x megacore: keep >= 2 out-feature blocks on the "parallel" axis when possible.
    if n128 >= 256:
        tn = min(tn, _round_up(pl.cdiv(n128, 2), 128))
    # Shrink tn until the per-step working set fits a conservative VMEM budget
    # (48 MiB; safe on v7x's 64 MiB physical VMEM, generous on v5e/v6e).
    while tn > 128 and _vmem_estimate(block_m, tn, in_features) > (48 << 20):
        tn = max(128, _round_up(tn // 2, 128))

    n_pad = _round_up(out_features, tn)
    mu_t = jnp.asarray(weight_mu, jnp.float32).T
    sigma_t = jnp.asarray(weight_sigma, jnp.float32).T
    if n_pad != out_features:
        pad = n_pad - out_features
        mu_t = jnp.pad(mu_t, ((0, 0), (0, pad)))
        sigma_t = jnp.pad(sigma_t, ((0, 0), (0, pad)))  # zero sigma -> padded cols stay 0
    return NoisyLinearParams(mu_t, sigma_t, out_features, tn)


def noisy_linear_apply(x, params: NoisyLinearParams, eps_t, *, block_m=256):
    """y = x @ (mu + sigma * eps).T with explicit eps_t of shape (in_features, out_pad)."""
    batch, in_features = x.shape
    mu_t, sigma_t, out_features, tn = params
    n_pad = mu_t.shape[1]
    assert mu_t.shape[0] == in_features and eps_t.shape == mu_t.shape
    grid_n = n_pad // tn

    tm = min(_round_up(block_m, 8), _round_up(batch, 8))
    m_pad = _round_up(batch, tm)
    x_p = x.astype(jnp.float32)
    if m_pad != batch:
        x_p = jnp.pad(x_p, ((0, m_pad - batch), (0, 0)))
    grid_m = m_pad // tm

    vmem_limit = int(min(max(_vmem_estimate(tm, tn, in_features) * 5 // 4, 32 << 20),
                         100 << 20))

    y = pl.pallas_call(
        _noisy_linear_kernel,
        out_shape=jax.ShapeDtypeStruct((m_pad, n_pad), jnp.float32),
        grid_spec=pltpu.PrefetchScalarGridSpec(
            num_scalar_prefetch=0,
            grid=(grid_n, grid_m),  # out-feature blocks outer, batch blocks inner
            in_specs=[
                pl.BlockSpec((tm, in_features), lambda n, m: (m, 0)),   # x
                pl.BlockSpec((in_features, tn), lambda n, m: (0, n)),   # mu^T
                pl.BlockSpec((in_features, tn), lambda n, m: (0, n)),   # sigma^T
                pl.BlockSpec((in_features, tn), lambda n, m: (0, n)),   # eps^T
            ],
            out_specs=pl.BlockSpec((tm, tn), lambda n, m: (m, n)),
            scratch_shapes=[pltpu.VMEM((in_features, tn), jnp.float32)],
        ),
        compiler_params=pltpu.CompilerParams(
            dimension_semantics=("parallel", "arbitrary"),
            vmem_limit_bytes=vmem_limit,
        ),
    )(x_p, mu_t, sigma_t, eps_t)

    return y[:batch, :out_features]


def noisy_linear(x, params: NoisyLinearParams, key, *, block_m=256):
    """NoisyLinear forward: fresh N(0, 1) eps per call (matches torch.randn_like)."""
    eps_t = jax.random.normal(key, params.mu_t.shape, dtype=jnp.float32)
    return noisy_linear_apply(x, params, eps_t, block_m=block_m)


if __name__ == "__main__":
    batch, in_features, out_features = 8, 32, 64

    key = jax.random.PRNGKey(0)
    k_x, k_mu, k_eps, k_fwd = jax.random.split(key, 4)

    # Parameter init matching the module's __init__:
    #   weight_mu    ~ Uniform(-1, 1), shape (out_features, in_features)
    #   weight_sigma = 0.017,          shape (out_features, in_features)
    weight_mu = jax.random.uniform(
        k_mu, (out_features, in_features), dtype=jnp.float32, minval=-1.0, maxval=1.0
    )
    weight_sigma = jnp.full((out_features, in_features), 0.017, dtype=jnp.float32)
    x = jax.random.normal(k_x, (batch, in_features), dtype=jnp.float32)

    # One-time layout plumbing (done at init, not per forward).
    params = prepare_noisy_linear_params(weight_mu, weight_sigma)

    # Deterministic verification path: fix eps explicitly, compare against the
    # reference computation with the exact same noise.
    eps_t = jax.random.normal(k_eps, params.mu_t.shape, dtype=jnp.float32)
    y = jax.block_until_ready(noisy_linear_apply(x, params, eps_t))
    assert y.shape == (batch, out_features)

    eps = eps_t[:, :out_features].T                       # (out, in), torch layout
    w_noisy = weight_mu + weight_sigma * eps
    y_ref = x @ w_noisy.T
    assert jnp.allclose(y, y_ref, atol=1e-5, rtol=1e-5), "matmul / noise mismatch"

    # Noise statistics sanity check on the realization actually used.
    assert abs(float(eps.mean())) < 0.15, "noise mean off"
    assert abs(float(eps.std()) - 1.0) < 0.15, "noise std off"

    # Production path: fresh noise drawn from a key each forward call.
    y2 = jax.block_until_ready(noisy_linear(x, params, k_fwd))
    assert y2.shape == (batch, out_features)
    assert bool(jnp.all(jnp.isfinite(y2)))

    print("KERNEL_OK")
</pallas_src>

<mosaic_0001>
module attributes {stable_mosaic.version = 11 : i64} {
  func.func @_noisy_linear_kernel(%arg0: i32, %arg1: i32, %arg2: memref<8x32xf32, #tpu.memory_space<vmem>>, %arg3: memref<32x128xf32, #tpu.memory_space<vmem>>, %arg4: memref<32x128xf32, #tpu.memory_space<vmem>>, %arg5: memref<32x128xf32, #tpu.memory_space<vmem>>, %arg6: memref<8x128xf32, #tpu.memory_space<vmem>>, %arg7: memref<32x128xf32, #tpu.memory_space<vmem>>) attributes {dimension_semantics = [#tpu.dimension_semantics<parallel>, #tpu.dimension_semantics<arbitrary>], iteration_bounds = array<i64: 1, 1>, scalar_prefetch = 0 : i64, scratch_operands = 1 : i64, tpu.core_type = #tpu.core_type<tc>, window_params = [{transform_indices = @transform_0, window_bounds = array<i64: 8, 32>}, {transform_indices = @transform_1, window_bounds = array<i64: 32, 128>}, {transform_indices = @transform_2, window_bounds = array<i64: 32, 128>}, {transform_indices = @transform_3, window_bounds = array<i64: 32, 128>}, {transform_indices = @transform_4, window_bounds = array<i64: 8, 128>}]} {
    %c0_i32 = arith.constant 0 : i32
    %0 = arith.cmpi eq, %arg1, %c0_i32 : i32
    %1 = arith.extui %0 : i1 to i32
    %c0_i32_0 = arith.constant 0 : i32
    %2 = arith.cmpi ne, %1, %c0_i32_0 : i32
    scf.if %2 {
      %c0_6 = arith.constant 0 : index
      %c0_7 = arith.constant 0 : index
      %7 = vector.load %arg3[%c0_6, %c0_7] : memref<32x128xf32, #tpu.memory_space<vmem>>, vector<32x128xf32>
      %c0_8 = arith.constant 0 : index
      %c0_9 = arith.constant 0 : index
      %8 = vector.load %arg4[%c0_8, %c0_9] : memref<32x128xf32, #tpu.memory_space<vmem>>, vector<32x128xf32>
      %c0_10 = arith.constant 0 : index
      %c0_11 = arith.constant 0 : index
      %9 = vector.load %arg5[%c0_10, %c0_11] : memref<32x128xf32, #tpu.memory_space<vmem>>, vector<32x128xf32>
      %10 = arith.mulf %8, %9 : vector<32x128xf32>
      %11 = arith.addf %7, %10 : vector<32x128xf32>
      %c0_12 = arith.constant 0 : index
      %c0_13 = arith.constant 0 : index
      %12 = vector.load %arg7[%c0_12, %c0_13] : memref<32x128xf32, #tpu.memory_space<vmem>>, vector<32x128xf32>
      tpu.vector_store %arg7[%c0_12, %c0_13], %11 {strides = array<i32>} : memref<32x128xf32, #tpu.memory_space<vmem>>, vector<32x128xf32>,
    } else {
    }
    %c0 = arith.constant 0 : index
    %c0_1 = arith.constant 0 : index
    %3 = vector.load %arg2[%c0, %c0_1] : memref<8x32xf32, #tpu.memory_space<vmem>>, vector<8x32xf32>
    %c0_2 = arith.constant 0 : index
    %c0_3 = arith.constant 0 : index
    %4 = vector.load %arg7[%c0_2, %c0_3] : memref<32x128xf32, #tpu.memory_space<vmem>>, vector<32x128xf32>
    %cst = arith.constant dense<0.000000e+00> : vector<8x128xf32>
    %5 = tpu.matmul %3, %4, %cst {dimension_numbers = #tpu.dot_dimension_numbers<[1], [0], [0], [1], [0, 0, 1, 1], [], []>} : vector<8x32xf32>, vector<32x128xf32>, vector<8x128xf32> -> vector<8x128xf32>
    %c0_4 = arith.constant 0 : index
    %c0_5 = arith.constant 0 : index
    %6 = vector.load %arg6[%c0_4, %c0_5] : memref<8x128xf32, #tpu.memory_space<vmem>>, vector<8x128xf32>
    tpu.vector_store %arg6[%c0_4, %c0_5], %5 {strides = array<i32>} : memref<8x128xf32, #tpu.memory_space<vmem>>, vector<8x128xf32>,
    return
  }
  func.func @transform_0(%arg0: i32, %arg1: i32) -> (i32, i32) {
    %c0_i32 = arith.constant 0 : i32
    %c0_i32_0 = arith.constant 0 : i32
    return %arg1, %c0_i32 : i32, i32
  }
  func.func @transform_1(%arg0: i32, %arg1: i32) -> (i32, i32) {
    %c0_i32 = arith.constant 0 : i32
    %c0_i32_0 = arith.constant 0 : i32
    return %c0_i32, %arg0 : i32, i32
  }
  func.func @transform_2(%arg0: i32, %arg1: i32) -> (i32, i32) {
    %c0_i32 = arith.constant 0 : i32
    %c0_i32_0 = arith.constant 0 : i32
    return %c0_i32, %arg0 : i32, i32
  }
  func.func @transform_3(%arg0: i32, %arg1: i32) -> (i32, i32) {
    %c0_i32 = arith.constant 0 : i32
    %c0_i32_0 = arith.constant 0 : i32
    return %c0_i32, %arg0 : i32, i32
  }
  func.func @transform_4(%arg0: i32, %arg1: i32) -> (i32, i32) {
    %c0_i32 = arith.constant 0 : i32
    return %arg1, %arg0 : i32, i32
  }
}

</mosaic_0001>

<bundles_post_ra>
// kernel: tpu_custom_call.1
= control target key start
LH: loop header
LB: loop body
LE: loop exit
PB: predicated region body
PF: predicated region fallthrough
CT: control target
= control target key end

     0   :  { %9 = vsyncpa [#allocation4], 0  ;;  %s451_s0 = inlined_call_operand.hbm [shape: f32[8,32], index: 0, kind: input, shape index: {}]   ;;  %s452_s1 = inlined_call_operand.hbm [shape: f32[32,128], index: 1, kind: input, shape index: {}]   ;;  %s453_s2 = inlined_call_operand.hbm [shape: f32[32,128], index: 2, kind: input, shape index: {}]   ;;  %s454_s3 = inlined_call_operand.hbm [shape: f32[32,128], index: 3, kind: input, shape index: {}]   ;;  %s455_s4 = inlined_call_operand.hbm [shape: f32[8,128], index: 4, kind: output, shape index: {}]  }
   0x1   :  { %10 = vsyncpa [#allocation7], 0 }
   0x2   :  { %11 = vsyncpa [#allocation10], 0 }
   0x3   :  { %12 = vsyncpa [#allocation5], 0  ;;  %s347_s15 = smov [#allocation6]   ;;  %s229_s19 = scalar_lea.hbm %s452_s1, 512 }
   0x4   :  { %s28_s16 = sshll.u32 %s347_s15, 4  ;;  %p230_p0 = scmp.ne.s32.totalorder %s452_s1, %s229_s19  ;;  %s29_s16 = int_to_ptr.vmem [resolvable:$true] %s28_s16 }
   0x5   :  { %p233_p1 = scmp.lt.u32.totalorder %s229_s19, %s452_s1 }
   0x7   :  { %p235_p2 = pnand %p233_p1, %p230_p0 }
   0x9   :  { %238 = shalt.err (!%p235_p2)
}
   0xa   :  { %s239_s24 = scalar_lea.vmem %s29_s16, 512  ;;  %p244_p4 = scmp.lt.s32.totalorder %s29_s16, %s29_s16 }
   0xb   :  { %p240_p3 = scmp.ne.s32.totalorder %s29_s16, %s239_s24  ;;  %p245_p5 = scmp.lt.s32.totalorder %s239_s24, %s239_s24 }
   0xd   :  { %p246_p6 = por %p245_p5, %p244_p4 }
   0xf   :  { %p247_p7 = pnand %p246_p6, %p240_p3 }
  0x11   :  { %250 = shalt.err (!%p247_p7)
}
  0x12   :  { %s348_s25 = smov 128   ;;  %s349_s26 = smov 8  }
  0x13   :  { %34 = dma.hbm_to_vmem [thread:$0]  %s452_s1, 512, %s29_s16, [#allocation7], %s348_s25, %s348_s25, %s349_s26  }
  0x14   :  { %s350_s29 = smov [#allocation3]   ;;  %s351_s5 = smov [#allocation8]  }
  0x15   :  { %s19_s30 = sshll.u32 %s350_s29, 4  ;;  %s40_s6 = sshll.u32 %s351_s5, 4  ;;  %s20_s30 = int_to_ptr.vmem [resolvable:$true] %s19_s30  ;;  %s41_s6 = int_to_ptr.vmem [resolvable:$true] %s40_s6 }
  0x16   :  { %s251_s9 = scalar_lea.hbm %s451_s0, 128 }
  0x17   :  { %p252_p8 = scmp.ne.s32.totalorder %s451_s0, %s251_s9  ;;  %p255_p9 = scmp.lt.u32.totalorder %s251_s9, %s451_s0 }
  0x19   :  { %p257_p10 = pnand %p255_p9, %p252_p8 }
  0x1b   :  { %260 = shalt.err (!%p257_p10)
}
  0x1c   :  { %s261_s1 = scalar_lea.vmem %s20_s30, 128  ;;  %p266_p12 = scmp.lt.s32.totalorder %s20_s30, %s20_s30 }
  0x1d   :  { %p262_p11 = scmp.ne.s32.totalorder %s20_s30, %s261_s1  ;;  %p267_p13 = scmp.lt.s32.totalorder %s261_s1, %s261_s1 }
  0x1f   :  { %p268_p0 = por %p267_p13, %p266_p12 }
  0x21   :  { %p269_p1 = pnand %p268_p0, %p262_p11 }
  0x23   :  { %272 = shalt.err (!%p269_p1)
}
  0x24   :  { %22 = dma.hbm_to_vmem [thread:$0]  %s451_s0, 128, %s20_s30, [#allocation4]  }
  0x25   :  { %s273_s18 = scalar_lea.hbm %s453_s2, 512 }
  0x26   :  { %p274_p2 = scmp.ne.s32.totalorder %s453_s2, %s273_s18  ;;  %p277_p3 = scmp.lt.u32.totalorder %s273_s18, %s453_s2 }
  0x28   :  { %p279_p4 = pnand %p277_p3, %p274_p2 }
  0x2a   :  { %282 = shalt.err (!%p279_p4)
}
  0x2b   :  { %s283_s23 = scalar_lea.vmem %s41_s6, 512  ;;  %p288_p6 = scmp.lt.s32.totalorder %s41_s6, %s41_s6 }
  0x2c   :  { %p284_p5 = scmp.ne.s32.totalorder %s41_s6, %s283_s23  ;;  %p289_p7 = scmp.lt.s32.totalorder %s283_s23, %s283_s23 }
  0x2e   :  { %p290_p8 = por %p289_p7, %p288_p6 }
  0x30   :  { %p291_p9 = pnand %p290_p8, %p284_p5 }
  0x32   :  { %294 = shalt.err (!%p291_p9)
}
  0x33   :  { %46 = dma.hbm_to_vmem [thread:$0]  %s453_s2, 512, %s41_s6, [#allocation7], %s348_s25, %s348_s25, %s349_s26  }
  0x34   :  { %s352_s27 = smov [#allocation9]   ;;  %s295_s5 = scalar_lea.hbm %s454_s3, 512 }
  0x35   :  { %s52_s28 = sshll.u32 %s352_s27, 4  ;;  %p296_p10 = scmp.ne.s32.totalorder %s454_s3, %s295_s5  ;;  %s53_s28 = int_to_ptr.vmem [resolvable:$true] %s52_s28 }
  0x36   :  { %p299_p11 = scmp.lt.u32.totalorder %s295_s5, %s454_s3 }
  0x38   :  { %p301_p12 = pnand %p299_p11, %p296_p10 }
  0x3a   :  { %304 = shalt.err (!%p301_p12)
}
  0x3b   :  { %s305_s11 = scalar_lea.vmem %s53_s28, 512  ;;  %p310_p0 = scmp.lt.s32.totalorder %s53_s28, %s53_s28 }
  0x3c   :  { %p306_p13 = scmp.ne.s32.totalorder %s53_s28, %s305_s11  ;;  %p311_p1 = scmp.lt.s32.totalorder %s305_s11, %s305_s11 }
  0x3e   :  { %p312_p2 = por %p311_p1, %p310_p0 }
  0x40   :  { %p313_p3 = pnand %p312_p2, %p306_p13 }
  0x42   :  { %316 = shalt.err (!%p313_p3)
}
  0x43   :  { %58 = dma.hbm_to_vmem [thread:$0]  %s454_s3, 512, %s53_s28, [#allocation10], %s348_s25, %s348_s25, %s349_s26  }
  0x44   :  { %339 = dma.done.wait [#allocation4], 128  }
  0x45   :  { %340 = vsyncadd [#allocation4], 4294967168 }
  0x46   :  { %341 = dma.done.wait [#allocation7], 1024  }
  0x47   :  { %342 = vsyncadd [#allocation7], 4294966272 }
  0x48   :  { %343 = dma.done.wait [#allocation10], 512  }
  0x49   :  { %344 = vsyncadd [#allocation10], 4294966784  ;;  %v353_v0 = vmov 0.0|0.0   ;;  %vm354_vm0 = vmmov 0   ;;  %v355_v1 = vmov 0.0   ;;  %v75_v2 = vld [vmem:[#allocation6] sm:$0xff] }
  0x4a   :  { %213 = vmatprep.subr.bf16.mxu0 %v353_v0  ;;  %210 = vmatprep.mubr.msk.f32.mxu0 %vm354_vm0, %v355_v1  ;;  %v76_v3 = vld [vmem:[#allocation6 + $0x8] sm:$0xff]  ;;  %v79_v4 = vld [vmem:[#allocation8] sm:$0xff]  ;;  %v77_v10 = vld [vmem:[#allocation6 + $0x10] sm:$0xff]  ;;  %vm104_vm1 = vcmask 261120   ;;  %s356_s3 = smov [#allocation11]  }
  0x4b   :  { %v80_v5 = vld [vmem:[#allocation8 + $0x8] sm:$0xff]  ;;  %v83_v6 = vld [vmem:[#allocation9] sm:$0xff]  ;;  %v78_v11 = vld [vmem:[#allocation6 + $0x18] sm:$0xff]  ;;  %s185_s25 = sshll.u32 %s356_s3, 4  ;;  %s186_s25 = int_to_ptr.vmem [resolvable:$true] %s185_s25 }
  0x4c   :  { %v84_v7 = vld [vmem:[#allocation9 + $0x8] sm:$0xff]  ;;  %v87_v8 = vmul.f32 %v83_v6, %v79_v4  ;;  %v81_v12 = vld [vmem:[#allocation8 + $0x10] sm:$0xff]  ;;  %v82_v13 = vld [vmem:[#allocation8 + $0x18] sm:$0xff]  ;;  %s317_s26 = scalar_lea.vmem %s186_s25, 128  ;;  %p322_p5 = scmp.lt.s32.totalorder %s186_s25, %s186_s25 }
  0x4d   :  { %v88_v9 = vmul.f32 %v84_v7, %v80_v5  ;;  %v85_v14 = vld [vmem:[#allocation9 + $0x10] sm:$0xff]  ;;  %v86_v15 = vld [vmem:[#allocation9 + $0x18] sm:$0xff]  ;;  %p318_p4 = scmp.ne.s32.totalorder %s186_s25, %s317_s26  ;;  %p323_p6 = scmp.lt.s32.totalorder %s317_s26, %s317_s26 }
  0x4e   :  { %v91_v16 = vadd.f32 %v87_v8, %v75_v2  ;;  %v89_v18 = vmul.f32 %v85_v14, %v81_v12  ;;  %v90_v19 = vmul.f32 %v86_v15, %v82_v13  ;;  %v99_v24 = vld [vmem:[#allocation3] sm:$0xff] }
  0x4f   :  { %v92_v17 = vadd.f32 %v88_v9, %v76_v3  ;;  %p324_p7 = por %p323_p6, %p322_p5 }
  0x50   :  { %v93_v21 = vadd.f32 %v89_v18, %v77_v10  ;;  %v94_v22 = vadd.f32 %v90_v19, %v78_v11 }
  0x51   :  { %v214_v20 = vpack.c.bf16 %v92_v17, %v91_v16  ;;  %p325_p8 = pnand %p324_p7, %p318_p4 }
  0x52   :  { %v217_v23 = vpack.c.bf16 %v94_v22, %v93_v21 }
  0x53   :  { %215 = vmatpush3.bf16.msra.mxu0 %v214_v20 }
  0x54   :  { %216 = vmatprep.subr.bf16.mxu0 %v353_v0 }
  0x57   :  { %218 = vmatpush3.bf16.msra.mxu0 %v217_v23 }
  0x5a   :  { %211 = vmatmul.mubr.msk.f32.vlgmr.msra.gmra.mrb[0].mxu0 %vm104_vm1, %v99_v24 }
 0x12d   :  { %v174_v25 = vpop.f32.mrb[0].mxu0 }
 0x12e   :  { %178 = vst [vmem:[#allocation11] sm:$0xff] %v174_v25  ;;  %v212_v26 = vpop.f32.mrb[1].mxu0 }
 0x12f   :  { %328 = shalt.err (!%p325_p8)
}
 0x130   :  { %s329_s1 = scalar_lea.hbm %s455_s4, 128 }
 0x131   :  { %p330_p9 = scmp.ne.s32.totalorder %s455_s4, %s329_s1  ;;  %p333_p10 = scmp.lt.u32.totalorder %s329_s1, %s455_s4 }
 0x133   :  { %p335_p11 = pnand %p333_p10, %p330_p9 }
 0x135   :  { %338 = shalt.err (!%p335_p11)
}
 0x136   :  { %188 = dma.vmem_to_hbm [thread:$0]  %s186_s25, 128, %s455_s4, [#allocation5]  }
 0x137   :  { %345 = dma.done.wait [#allocation5], 128  }
 0x138   :  { %346 = vsyncadd [#allocation5], 4294967168 }
 0x139   :  { %192 = vsyncpa [#allocation4], 1 }
 0x13a   :  { %193 = vsyncpa [#allocation7], 1 }
 0x13b   :  { %194 = vsyncpa [#allocation10], 1 }
 0x13c   :  { %195 = vsyncpa [#allocation5], 1 }

</bundles_post_ra>
